<compile_context>
chip_gen: v5e
topology: v5e:2x2
jax: 0.10.0
libtpu: 0.0.40
codegen_flags: <defaults>
</compile_context>

<pallas_src>
import functools
import math

import jax
import jax.numpy as jnp
from jax import lax
from jax.experimental import pallas as pl
from jax.experimental.pallas import tpu as pltpu


def _spconv_kernel(x_ref, w_ref, b_ref, o_ref, rhs_ref, *, KH, KW, W, Cin, L):
    """One batch element per grid step.

    x_ref:   (1, Cin, H*W)    spatially flattened NCHW input
    w_ref:   (OC, KH*KW*Cin)  packed weights, column order t*Cin + c, t = kh*KW + kw
    b_ref:   (OC, 1)          bias
    o_ref:   (1, OC, L)       L = Ho*W; per row, columns w >= Wo are junk (dropped later)
    rhs_ref: (KH*KW*Cin, L)   VMEM scratch holding the im2col RHS
    """
    x = x_ref[0]                                 # (Cin, H*W)
    HW = x.shape[-1]

    # Build the im2col RHS with KH*KW wide contiguous slices (no per-row slicing).
    rhs_ref[...] = jnp.zeros_like(rhs_ref)
    for kh in range(KH):                         # static, tiny tap loop (unrolled)
        for kw in range(KW):
            t = kh * KW + kw
            off = kh * W + kw
            n = min(L, HW - off)                 # in-bounds width; tail cols are junk cols
            rhs_ref[t * Cin:(t + 1) * Cin, 0:n] = x[:, off:off + n]

    # Single lane-dense MXU matmul: (OC, K) @ (K, Ho*W), bias fused.
    res = jnp.dot(w_ref[...], rhs_ref[...], preferred_element_type=jnp.float32)
    o_ref[0] = (res + b_ref[...]).astype(o_ref.dtype)


def sp_conv_transpose2d(x, weight, bias, *, r):
    """SPConvTranspose2d forward.

    x: (B, Cin, H, W) NCHW; weight: (Cout*r, Cin, KH, KW) OIHW; bias: (Cout*r,)
    returns: (B, Cout, Ho, Wo*r) with Ho = H-KH+1, Wo = W-KW+1.
    """
    B, Cin, H, W = x.shape
    OC, wcin, KH, KW = weight.shape
    assert wcin == Cin and OC % r == 0
    Cout = OC // r
    Ho, Wo = H - KH + 1, W - KW + 1
    HW = H * W
    L = Ho * W
    K = KH * KW * Cin

    # Free reshape (contiguous) -- no activation transpose / HBM relayout.
    x_flat = x.reshape(B, Cin, HW)
    # One-time tiny weight pack: column index = (kh*KW + kw)*Cin + c.
    w_pack = jnp.transpose(weight, (0, 2, 3, 1)).reshape(OC, K)
    b2d = bias.reshape(OC, 1).astype(jnp.float32)

    kernel = functools.partial(_spconv_kernel, KH=KH, KW=KW, W=W, Cin=Cin, L=L)
    conv = pl.pallas_call(
        kernel,
        out_shape=jax.ShapeDtypeStruct((B, OC, L), x.dtype),
        grid=(B,),
        in_specs=[
            pl.BlockSpec((1, Cin, HW), lambda b: (b, 0, 0)),
            pl.BlockSpec((OC, K), lambda b: (0, 0)),
            pl.BlockSpec((OC, 1), lambda b: (0, 0)),
        ],
        out_specs=pl.BlockSpec((1, OC, L), lambda b: (b, 0, 0)),
        scratch_shapes=[pltpu.VMEM((K, L), x.dtype)],
        compiler_params=pltpu.CompilerParams(
            dimension_semantics=("parallel",)),
    )(x_flat, w_pack, b2d)

    # Sub-pixel shuffle (torch: view -> permute -> view) + drop of the W-Wo junk
    # columns; one small fused XLA copy on the tiny conv output.
    conv = conv.reshape(B, r, Cout, Ho, W)[..., :Wo]
    out = jnp.transpose(conv, (0, 2, 3, 4, 1)).reshape(B, Cout, Ho, Wo * r)
    return out


def _reference(x, weight, bias, r):
    conv = lax.conv_general_dilated(
        x, weight, window_strides=(1, 1), padding="VALID",
        dimension_numbers=("NCHW", "OIHW", "NCHW"))
    conv = conv + bias.reshape(1, -1, 1, 1)
    B, OC, Ho, Wo = conv.shape
    Cout = OC // r
    out = conv.reshape(B, r, Cout, Ho, Wo)
    out = jnp.transpose(out, (0, 2, 3, 4, 1)).reshape(B, Cout, Ho, Wo * r)
    return out


if __name__ == "__main__":
    # Small shapes consistent with DPT-EGNet usage: kernel_size=(1, 3), r=2.
    B, Cin, H, W = 2, 4, 8, 16
    Cout, r = 4, 2
    KH, KW = 1, 3
    OC = Cout * r

    key = jax.random.PRNGKey(0)
    kx, kw_, kb = jax.random.split(key, 3)
    x = jax.random.normal(kx, (B, Cin, H, W), jnp.float32)

    # Deterministic Conv2d-style init (uniform in +-1/sqrt(fan_in)).
    fan_in = Cin * KH * KW
    bound = 1.0 / math.sqrt(fan_in)
    weight = jax.random.uniform(
        kw_, (OC, Cin, KH, KW), jnp.float32, minval=-bound, maxval=bound)
    bias = jax.random.uniform(
        kb, (OC,), jnp.float32, minval=-bound, maxval=bound)

    fn = jax.jit(functools.partial(sp_conv_transpose2d, r=r))
    out = jax.block_until_ready(fn(x, weight, bias))

    ref = _reference(x, weight, bias, r)
    assert out.shape == (B, Cout, H - KH + 1, (W - KW + 1) * r), out.shape
    if not jnp.allclose(out, ref, atol=1e-5, rtol=1e-5):
        raise AssertionError("Pallas kernel output does not match reference")
    print("KERNEL_OK")
</pallas_src>

<mosaic_0001>
module attributes {stable_mosaic.version = 11 : i64} {
  func.func @_spconv_kernel(%arg0: i32, %arg1: memref<1x4x128xf32, #tpu.memory_space<vmem>>, %arg2: memref<8x12xf32, #tpu.memory_space<vmem>>, %arg3: memref<8x1xf32, #tpu.memory_space<vmem>>, %arg4: memref<1x8x128xf32, #tpu.memory_space<vmem>>, %arg5: memref<12x128xf32, #tpu.memory_space<vmem>>) attributes {dimension_semantics = [#tpu.dimension_semantics<parallel>], iteration_bounds = array<i64: 2>, scalar_prefetch = 0 : i64, scratch_operands = 1 : i64, tpu.core_type = #tpu.core_type<tc>, window_params = [{transform_indices = @transform_0, window_bounds = array<i64: 1, 4, 128>}, {pipeline_mode = #tpu.pipeline_mode<synchronous>, transform_indices = @transform_1, window_bounds = array<i64: 8, 12>}, {pipeline_mode = #tpu.pipeline_mode<synchronous>, transform_indices = @transform_2, window_bounds = array<i64: 8, 1>}, {transform_indices = @transform_3, window_bounds = array<i64: 1, 8, 128>}]} {
    %c0 = arith.constant 0 : index
    %c0_0 = arith.constant 0 : index
    %c0_1 = arith.constant 0 : index
    %0 = vector.load %arg1[%c0, %c0_0, %c0_1] : memref<1x4x128xf32, #tpu.memory_space<vmem>>, vector<1x4x128xf32>
    %1 = vector.shape_cast %0 : vector<1x4x128xf32> to vector<4x128xf32>
    %cst = arith.constant 0.000000e+00 : f32
    %2 = vector.broadcast %cst : f32 to vector<12x128xf32>
    %c0_2 = arith.constant 0 : index
    %c0_3 = arith.constant 0 : index
    %3 = vector.load %arg5[%c0_2, %c0_3] : memref<12x128xf32, #tpu.memory_space<vmem>>, vector<12x128xf32>
    tpu.vector_store %arg5[%c0_2, %c0_3], %2 {strides = array<i32>} : memref<12x128xf32, #tpu.memory_space<vmem>>, vector<12x128xf32>,
    %c0_4 = arith.constant 0 : index
    %c0_5 = arith.constant 0 : index
    %4 = vector.load %arg5[%c0_4, %c0_5] : memref<12x128xf32, #tpu.memory_space<vmem>>, vector<4x128xf32>
    tpu.vector_store %arg5[%c0_4, %c0_5], %1 {strides = array<i32>} : memref<12x128xf32, #tpu.memory_space<vmem>>, vector<4x128xf32>,
    %5 = vector.extract_strided_slice %1 {offsets = [0, 1], sizes = [4, 127], strides = [1, 1]} : vector<4x128xf32> to vector<4x127xf32>
    %c4 = arith.constant 4 : index
    %c0_6 = arith.constant 0 : index
    %6 = vector.load %arg5[%c4, %c0_6] : memref<12x128xf32, #tpu.memory_space<vmem>>, vector<4x127xf32>
    tpu.vector_store %arg5[%c4, %c0_6], %5 {strides = array<i32>} : memref<12x128xf32, #tpu.memory_space<vmem>>, vector<4x127xf32>,
    %7 = vector.extract_strided_slice %1 {offsets = [0, 2], sizes = [4, 126], strides = [1, 1]} : vector<4x128xf32> to vector<4x126xf32>
    %c8 = arith.constant 8 : index
    %c0_7 = arith.constant 0 : index
    %8 = vector.load %arg5[%c8, %c0_7] : memref<12x128xf32, #tpu.memory_space<vmem>>, vector<4x126xf32>
    tpu.vector_store %arg5[%c8, %c0_7], %7 {strides = array<i32>} : memref<12x128xf32, #tpu.memory_space<vmem>>, vector<4x126xf32>,
    %c0_8 = arith.constant 0 : index
    %c0_9 = arith.constant 0 : index
    %9 = vector.load %arg2[%c0_8, %c0_9] : memref<8x12xf32, #tpu.memory_space<vmem>>, vector<8x12xf32>
    %c0_10 = arith.constant 0 : index
    %c0_11 = arith.constant 0 : index
    %10 = vector.load %arg5[%c0_10, %c0_11] : memref<12x128xf32, #tpu.memory_space<vmem>>, vector<12x128xf32>
    %cst_12 = arith.constant dense<0.000000e+00> : vector<8x128xf32>
    %11 = tpu.matmul %9, %10, %cst_12 {dimension_numbers = #tpu.dot_dimension_numbers<[1], [0], [0], [1], [0, 0, 1, 1], [], []>} : vector<8x12xf32>, vector<12x128xf32>, vector<8x128xf32> -> vector<8x128xf32>
    %c0_13 = arith.constant 0 : index
    %c0_14 = arith.constant 0 : index
    %12 = vector.load %arg3[%c0_13, %c0_14] : memref<8x1xf32, #tpu.memory_space<vmem>>, vector<8x1xf32>
    %13 = vector.broadcast %12 : vector<8x1xf32> to vector<8x128xf32>
    %14 = arith.addf %11, %13 : vector<8x128xf32>
    %c0_15 = arith.constant 0 : index
    %c0_16 = arith.constant 0 : index
    %c0_17 = arith.constant 0 : index
    %15 = vector.load %arg4[%c0_15, %c0_16, %c0_17] : memref<1x8x128xf32, #tpu.memory_space<vmem>>, vector<1x8x128xf32>
    %16 = vector.shape_cast %15 : vector<1x8x128xf32> to vector<8x128xf32>
    %17 = vector.shape_cast %14 : vector<8x128xf32> to vector<1x8x128xf32>
    tpu.vector_store %arg4[%c0_15, %c0_16, %c0_17], %17 {strides = array<i32>} : memref<1x8x128xf32, #tpu.memory_space<vmem>>, vector<1x8x128xf32>,
    return
  }
  func.func @transform_0(%arg0: i32) -> (i32, i32, i32) {
    %c0_i32 = arith.constant 0 : i32
    %c0_i32_0 = arith.constant 0 : i32
    %c0_i32_1 = arith.constant 0 : i32
    return %arg0, %c0_i32, %c0_i32_0 : i32, i32, i32
  }
  func.func @transform_1(%arg0: i32) -> (i32, i32) {
    %c0_i32 = arith.constant 0 : i32
    %c0_i32_0 = arith.constant 0 : i32
    %c0_i32_1 = arith.constant 0 : i32
    return %c0_i32, %c0_i32_0 : i32, i32
  }
  func.func @transform_2(%arg0: i32) -> (i32, i32) {
    %c0_i32 = arith.constant 0 : i32
    %c0_i32_0 = arith.constant 0 : i32
    %c0_i32_1 = arith.constant 0 : i32
    return %c0_i32, %c0_i32_0 : i32, i32
  }
  func.func @transform_3(%arg0: i32) -> (i32, i32, i32) {
    %c0_i32 = arith.constant 0 : i32
    %c0_i32_0 = arith.constant 0 : i32
    %c0_i32_1 = arith.constant 0 : i32
    return %arg0, %c0_i32, %c0_i32_0 : i32, i32, i32
  }
}

</mosaic_0001>

<bundles_post_ra>
// kernel: sp_conv_transpose2d.1
= control target key start
LH: loop header
LB: loop body
LE: loop exit
PB: predicated region body
PF: predicated region fallthrough
CT: control target
= control target key end

     0   :  { %s329_s12 = smov 0   ;;  %s356_s0 = inlined_call_operand.vmem [shape: f32[2,4,128], index: 0, kind: input, shape index: {}]   ;;  %s357_s1 = inlined_call_operand.vmem [shape: f32[8,12], index: 1, kind: input, shape index: {}]   ;;  %s358_s2 = inlined_call_operand.vmem [shape: f32[8,1], index: 2, kind: input, shape index: {}]   ;;  %s359_s3 = inlined_call_operand.vmem [shape: f32[2,8,128], index: 3, kind: output, shape index: {}]  }
   0x1 LB: > { %s272_s13 = sadd.s32 4294967295, %s303_s12   ;;  %p276_p0 = scmp.ge.s32.totalorder %s303_s12, 1  ;;  %s303_s12 = sphi %s329_s12, %s13_s12  }
   0x2   : > { %p136_p1 = scmp.lt.s32.totalorder %s303_s12, 3 }
   0x4   : > { %p137_p2 = pnand %p276_p0, %p136_p1 }
   0x5   : > { %p158_p3 = scmp.lt.s32.totalorder (!%p137_p2), %s272_s13, 1  ;;  %s306_s18 = smov (!%p137_p2), 126  }
   0x6   : > { %140 = sbr.rel (%p137_p2) target bundleno = 276 (0x114), region = 32  ;;  %s307_s19 = smov (!%p137_p2), 127  }
   0xb   : > { %v305_v0 = vmov 0.0   ;;  %s361_s13 = smov (!%p158_p3, %s272_s13), 1  ;;  %v184_v2 = vld [vmem:[%s358_s2] sm:$0xff]  ;;  %v308_v3 = vmov 0   ;;  %vm179_vm0 = vcmask 1027072   ;;  %vm174_vm1 = vcmask 1035264  }
   0xc   : > { %167 = vst [vmem:[#allocation2] sm:$0xff] %v305_v0  ;;  %s277_s14 = sshll.u32 %s361_s13, 2  ;;  %295 = vset.pattern.permute.xlu1 %v308_v3  ;;  %296 = vset.pattern.permute.xlu0 %v308_v3  ;;  %vm194_vm2 = vcmask 1043456   ;;  %v181_v7 = vld [vmem:[%s357_s1] sm:$0xff]  ;;  %vm190_vm3 = vcmask 97280   ;;  %s278_s24 = sshll.u32 %s361_s13, 3 }
   0xd   : > { %168 = vst [vmem:[#allocation2 + $0x8] sm:$0xf] %v305_v0  ;;  %s161_s17 = scalar_lea.vmem %s356_s0, %s277_s14  ;;  %187 = vperm.xlu1 %295, %v184_v2   ;;  %s165_s27 = scalar_lea.vmem %s359_s3, %s278_s24 }
   0xe   : > { %v166_v1 = vld [vmem:[%s161_s17] sm:$0xf] }
   0xf   : > { %176 = vrot.lane.b32.xlu0 %v166_v1, %s306_s18  ;;  %169 = vst [vmem:[#allocation2] sm:$0xf] %v166_v1 }
  0x17   : > { %171 = vrot.lane.b32.xlu0 %v166_v1, %s307_s19 }
  0x7f   : > { %v188_v9 = vpop.permute.xlu1 %187 }
  0x81   : > { %v177_v4 = vpop.permute.xlu0 %176 }
  0x82   : > { %180 = vst.msk [vmem:[#allocation2 + $0x8] sm:$0xf] %vm179_vm0, %v177_v4 }
  0x89   : > { %v172_v5 = vpop.permute.xlu0 %171  ;;  %v183_v6 = vld [vmem:[#allocation2 + $0x8] sm:$0xf] }
  0x8a   : > { %175 = vst.msk [vmem:[#allocation2 + $0x4] sm:$0xf] %vm174_vm1, %v172_v5  ;;  %279 = vmatpush.msk.msra.mxu0 %vm194_vm2, %v183_v6 }
  0x91   : > { %v182_v8 = vld [vmem:[#allocation2] sm:$0xff] }
  0x92   : > { %213 = vmatpush.msra.mxu0 %v182_v8 }
  0x93   : > { %280 = vmatmul.msk.f32.vlgmr.msra.gmra.mxu0 %vm190_vm3, %v181_v7 }
 0x110   : > { %v215_v10 = vpop.f32.mrf.mxu0 }
 0x111   : > { %v216_v11 = vadd.f32 %v215_v10, %v188_v9 }
 0x113   : > { %218 = vst [vmem:[%s165_s27] sm:$0xff] %v216_v11 }
 0x114 PF: > { %s13_s12 = sadd.s32 1, %s303_s12  }
 0x115   : > { %p10_p4 = scmp.ge.s32.totalorder %s13_s12, 4  }
 0x117   :  { %12 = sbr.rel (!%p10_p4) target bundleno = 1 (0x1), region = 62 }

</bundles_post_ra>
